<compile_context>
chip_gen: v5e
topology: v5e:2x2
jax: 0.10.0
libtpu: 0.0.40
codegen_flags: <defaults>
</compile_context>

<pallas_src>
from functools import partial

import jax
import jax.numpy as jnp
from jax.experimental import pallas as pl
from jax.experimental.pallas import tpu as pltpu


def _round_up(x, m):
    return (x + m - 1) // m * m


def _pick_tile(size, candidates=(512, 256, 128)):
    """Largest tile that divides `size` while leaving >=2 blocks (for megacore);
    falls back to the largest divisor.  `size` is always a multiple of 128."""
    for t in candidates:
        if size % t == 0 and size // t >= 2:
            return t
    for t in candidates:
        if size % t == 0:
            return t
    return candidates[-1]


# ---------------------------------------------------------------------------------
# Pallas kernel: out = W @ A + bias   (fp32 accumulate, bf16 MXU operands)
# ---------------------------------------------------------------------------------
def _cls_matmul_kernel(w_ref, a_ref, b_ref, o_ref, acc_ref):
    k = pl.program_id(1)

    @pl.when(k == 0)
    def _init():
        acc_ref[...] = jnp.zeros_like(acc_ref)

    acc_ref[...] += jnp.dot(w_ref[...], a_ref[...],
                            preferred_element_type=jnp.float32)

    @pl.when(k == pl.num_programs(1) - 1)
    def _finalize():
        # fp32 epilogue (bias add) — keep elementwise math in fp32 (v5e has no bf16 VPU)
        o_ref[...] = (acc_ref[...] + b_ref[...]).astype(o_ref.dtype)


def fused_matmul_bias(w, a, bias):
    """w: (N, K) bf16, a: (K, M) bf16, bias: (N, 1) fp32 -> (N, M) fp32.
    N multiple of 8, K and M multiples of 128 (caller pads)."""
    N, K = w.shape
    _, M = a.shape
    TM = _pick_tile(M)
    TK = K if K <= 1024 else 512
    assert K % TK == 0 and M % TM == 0 and N % 8 == 0

    return pl.pallas_call(
        _cls_matmul_kernel,
        out_shape=jax.ShapeDtypeStruct((N, M), jnp.float32),
        grid_spec=pltpu.PrefetchScalarGridSpec(
            num_scalar_prefetch=0,
            grid=(M // TM, K // TK),          # reduction axis (K) last
            in_specs=[
                pl.BlockSpec((N, TK), lambda m, k: (0, k)),   # weights (small, resident)
                pl.BlockSpec((TK, TM), lambda m, k: (k, m)),  # im2col columns (pipelined)
                pl.BlockSpec((N, 1), lambda m, k: (0, 0)),    # summed bias
            ],
            out_specs=pl.BlockSpec((N, TM), lambda m, k: (0, m)),
            scratch_shapes=[pltpu.VMEM((N, TM), jnp.float32)],
        ),
        compiler_params=pltpu.CompilerParams(
            dimension_semantics=("parallel", "arbitrary"),   # M sharded across TCs on v7x
            vmem_limit_bytes=32 * 1024 * 1024,               # fits v5e/v6e/v7x budgets
        ),
    )(w, a, bias)


# ---------------------------------------------------------------------------------
# im2col in transposed (K, M) layout: K = Cin*9 channel-major (matches torch
# weight.reshape(Cout, Cin*9)), M = B*Ho*Wo on the lane axis.
# ---------------------------------------------------------------------------------
def _im2col_t(x, dilation, padding):
    B, C, H, W = x.shape
    d, p = dilation, padding
    Ho = H + 2 * p - 2 * d
    Wo = W + 2 * p - 2 * d
    xp = jnp.pad(x, ((0, 0), (0, 0), (p, p), (p, p)))
    taps = []
    for i in range(3):
        for j in range(3):
            taps.append(jax.lax.slice(xp, (0, 0, i * d, j * d),
                                      (B, C, i * d + Ho, j * d + Wo)))
    col = jnp.stack(taps, axis=2)                 # (B, C, 9, Ho, Wo)
    col = col.transpose(1, 2, 0, 3, 4)            # (C, 9, B, Ho, Wo)
    return col.reshape(C * 9, B * Ho * Wo), (Ho, Wo)


# ---------------------------------------------------------------------------------
# Classifier_Module forward
# ---------------------------------------------------------------------------------
@partial(jax.jit, static_argnames=("dilations", "paddings"))
def classifier_module_forward(params, x, dilations, paddings):
    B, C, H, W = x.shape
    NoLabels = params[0]["w"].shape[0]

    # Fuse the 4 branches into ONE matmul: concat im2col matrices / weights along K.
    cols, out_hw = [], None
    for d, p in zip(dilations, paddings):
        a_d, hw = _im2col_t(x, d, p)
        assert out_hw is None or hw == out_hw, "branch output sizes must match"
        out_hw = hw
        cols.append(a_d)
    Ho, Wo = out_hw
    a = jnp.concatenate(cols, axis=0)                                      # (4*C*9, M)
    wmat = jnp.concatenate([pp["w"].reshape(NoLabels, C * 9) for pp in params],
                           axis=1)                                         # (NoLabels, 4*C*9)
    bias = sum(pp["b"] for pp in params)                                   # (NoLabels,)

    K_total, M = a.shape
    K_pad = _round_up(K_total, 128)
    if K_pad > 1024:
        K_pad = _round_up(K_total, 512)
    M_pad = _round_up(M, 128)
    N_pad = _round_up(NoLabels, 8)

    # bf16 MXU operands (v6e/v7x MXU runs bf16 at full rate; halves HBM/VMEM bytes).
    a_p = jnp.pad(a.astype(jnp.bfloat16), ((0, K_pad - K_total), (0, M_pad - M)))
    w_p = jnp.pad(wmat.astype(jnp.bfloat16),
                  ((0, N_pad - NoLabels), (0, K_pad - K_total)))
    b_p = jnp.pad(bias.astype(jnp.float32), (0, N_pad - NoLabels)).reshape(N_pad, 1)

    out = fused_matmul_bias(w_p, a_p, b_p)                                 # (N_pad, M_pad)
    out = out[:NoLabels, :M].reshape(NoLabels, B, Ho, Wo).transpose(1, 0, 2, 3)
    return out


# ---------------------------------------------------------------------------------
# main: deterministic small-shape test + pure-JAX reference check
# ---------------------------------------------------------------------------------
if __name__ == "__main__":
    key = jax.random.PRNGKey(0)
    B, C_in, H, W = 2, 8, 16, 16
    NoLabels = 8
    dilations = (3, 6, 12, 18)        # dilation_series == padding_series (as in the model)
    paddings = (3, 6, 12, 18)

    keys = jax.random.split(key, 1 + 2 * len(dilations))
    x = jax.random.normal(keys[0], (B, C_in, H, W), jnp.float32)
    params = []
    for i in range(len(dilations)):
        kw, kb = keys[1 + 2 * i], keys[2 + 2 * i]
        params.append({
            # weight.data.normal_(0, 0.01) as in the PyTorch module
            "w": 0.01 * jax.random.normal(kw, (NoLabels, C_in, 3, 3), jnp.float32),
            "b": 0.01 * jax.random.normal(kb, (NoLabels,), jnp.float32),
        })

    out = classifier_module_forward(params, x, dilations, paddings)
    out = jax.block_until_ready(out)

    # Reference: sum of dilated convs (fp32, highest precision).
    ref = None
    for pp, d, pad in zip(params, dilations, paddings):
        y = jax.lax.conv_general_dilated(
            x, pp["w"], window_strides=(1, 1), padding=((pad, pad), (pad, pad)),
            rhs_dilation=(d, d), dimension_numbers=("NCHW", "OIHW", "NCHW"),
            precision=jax.lax.Precision.HIGHEST)
        y = y + pp["b"][None, :, None, None]
        ref = y if ref is None else ref + y

    assert out.shape == (B, NoLabels, H, W), out.shape
    assert bool(jnp.all(jnp.isfinite(out)))
    max_err = float(jnp.max(jnp.abs(out - ref)))
    assert max_err < 2e-2, f"max abs error {max_err}"
    print("KERNEL_OK")
</pallas_src>

<mosaic_0001>
module attributes {stable_mosaic.version = 11 : i64} {
  func.func @_cls_matmul_kernel(%arg0: i32, %arg1: i32, %arg2: memref<8x384xbf16, #tpu.memory_space<vmem>>, %arg3: memref<384x256xbf16, #tpu.memory_space<vmem>>, %arg4: memref<8x1xf32, #tpu.memory_space<vmem>>, %arg5: memref<8x256xf32, #tpu.memory_space<vmem>>, %arg6: memref<8x256xf32, #tpu.memory_space<vmem>>) attributes {dimension_semantics = [#tpu.dimension_semantics<parallel>, #tpu.dimension_semantics<arbitrary>], iteration_bounds = array<i64: 2, 1>, scalar_prefetch = 0 : i64, scratch_operands = 1 : i64, tpu.core_type = #tpu.core_type<tc>, window_params = [{transform_indices = @transform_0, window_bounds = array<i64: 8, 384>}, {transform_indices = @transform_1, window_bounds = array<i64: 384, 256>}, {pipeline_mode = #tpu.pipeline_mode<synchronous>, transform_indices = @transform_2, window_bounds = array<i64: 8, 1>}, {transform_indices = @transform_3, window_bounds = array<i64: 8, 256>}]} {
    %c0_i32 = arith.constant 0 : i32
    %0 = arith.cmpi eq, %arg1, %c0_i32 : i32
    %1 = arith.extui %0 : i1 to i32
    %c0_i32_0 = arith.constant 0 : i32
    %2 = arith.cmpi ne, %1, %c0_i32_0 : i32
    scf.if %2 {
      %cst_10 = arith.constant 0.000000e+00 : f32
      %12 = vector.broadcast %cst_10 : f32 to vector<8x256xf32>
      %c0_11 = arith.constant 0 : index
      %c0_12 = arith.constant 0 : index
      %13 = vector.load %arg6[%c0_11, %c0_12] : memref<8x256xf32, #tpu.memory_space<vmem>>, vector<8x256xf32>
      tpu.vector_store %arg6[%c0_11, %c0_12], %12 {strides = array<i32>} : memref<8x256xf32, #tpu.memory_space<vmem>>, vector<8x256xf32>,
    } else {
    }
    %c0 = arith.constant 0 : index
    %c0_1 = arith.constant 0 : index
    %3 = vector.load %arg6[%c0, %c0_1] : memref<8x256xf32, #tpu.memory_space<vmem>>, vector<8x256xf32>
    %c0_2 = arith.constant 0 : index
    %c0_3 = arith.constant 0 : index
    %4 = vector.load %arg2[%c0_2, %c0_3] : memref<8x384xbf16, #tpu.memory_space<vmem>>, vector<8x384xbf16>
    %c0_4 = arith.constant 0 : index
    %c0_5 = arith.constant 0 : index
    %5 = vector.load %arg3[%c0_4, %c0_5] : memref<384x256xbf16, #tpu.memory_space<vmem>>, vector<384x256xbf16>
    %cst = arith.constant dense<0.000000e+00> : vector<8x256xf32>
    %6 = tpu.matmul %4, %5, %cst {dimension_numbers = #tpu.dot_dimension_numbers<[1], [0], [0], [1], [0, 0, 1, 1], [], []>} : vector<8x384xbf16>, vector<384x256xbf16>, vector<8x256xf32> -> vector<8x256xf32>
    %7 = arith.addf %3, %6 : vector<8x256xf32>
    %c0_6 = arith.constant 0 : index
    %c0_7 = arith.constant 0 : index
    %8 = vector.load %arg6[%c0_6, %c0_7] : memref<8x256xf32, #tpu.memory_space<vmem>>, vector<8x256xf32>
    tpu.vector_store %arg6[%c0_6, %c0_7], %7 {strides = array<i32>} : memref<8x256xf32, #tpu.memory_space<vmem>>, vector<8x256xf32>,
    %c0_i32_8 = arith.constant 0 : i32
    %9 = arith.cmpi eq, %arg1, %c0_i32_8 : i32
    %10 = arith.extui %9 : i1 to i32
    %c0_i32_9 = arith.constant 0 : i32
    %11 = arith.cmpi ne, %10, %c0_i32_9 : i32
    scf.if %11 {
      %c0_10 = arith.constant 0 : index
      %c0_11 = arith.constant 0 : index
      %12 = vector.load %arg6[%c0_10, %c0_11] : memref<8x256xf32, #tpu.memory_space<vmem>>, vector<8x256xf32>
      %c0_12 = arith.constant 0 : index
      %c0_13 = arith.constant 0 : index
      %13 = vector.load %arg4[%c0_12, %c0_13] : memref<8x1xf32, #tpu.memory_space<vmem>>, vector<8x1xf32>
      %14 = vector.broadcast %13 : vector<8x1xf32> to vector<8x256xf32>
      %15 = arith.addf %12, %14 : vector<8x256xf32>
      %c0_14 = arith.constant 0 : index
      %c0_15 = arith.constant 0 : index
      %16 = vector.load %arg5[%c0_14, %c0_15] : memref<8x256xf32, #tpu.memory_space<vmem>>, vector<8x256xf32>
      tpu.vector_store %arg5[%c0_14, %c0_15], %15 {strides = array<i32>} : memref<8x256xf32, #tpu.memory_space<vmem>>, vector<8x256xf32>,
    } else {
    }
    return
  }
  func.func @transform_0(%arg0: i32, %arg1: i32) -> (i32, i32) {
    %c0_i32 = arith.constant 0 : i32
    %c0_i32_0 = arith.constant 0 : i32
    return %c0_i32, %arg1 : i32, i32
  }
  func.func @transform_1(%arg0: i32, %arg1: i32) -> (i32, i32) {
    %c0_i32 = arith.constant 0 : i32
    return %arg1, %arg0 : i32, i32
  }
  func.func @transform_2(%arg0: i32, %arg1: i32) -> (i32, i32) {
    %c0_i32 = arith.constant 0 : i32
    %c0_i32_0 = arith.constant 0 : i32
    %c0_i32_1 = arith.constant 0 : i32
    return %c0_i32, %c0_i32_0 : i32, i32
  }
  func.func @transform_3(%arg0: i32, %arg1: i32) -> (i32, i32) {
    %c0_i32 = arith.constant 0 : i32
    %c0_i32_0 = arith.constant 0 : i32
    return %c0_i32, %arg0 : i32, i32
  }
}

</mosaic_0001>

<bundles_post_ra>
// kernel: classifier_module_forward.1
= control target key start
LH: loop header
LB: loop body
LE: loop exit
PB: predicated region body
PF: predicated region fallthrough
CT: control target
= control target key end

     0   :  { %s1290_s12 = smov 0   ;;  %s1292_s13 = smov 0   ;;  %s1566_s0 = inlined_call_operand.vmem [shape: bf16[8,384], index: 0, kind: input, shape index: {}]   ;;  %s1567_s1 = inlined_call_operand.vmem [shape: bf16[384,512], index: 1, kind: input, shape index: {}]   ;;  %s1568_s2 = inlined_call_operand.vmem [shape: f32[8,1], index: 2, kind: input, shape index: {}]   ;;  %s1569_s3 = inlined_call_operand.vmem [shape: f32[8,512], index: 3, kind: output, shape index: {}]  }
   0x1   :  { %s1294_s14 = smov 0   ;;  %s1296_s15 = smov 0  }
   0x2   :  { %s1298_s16 = smov 0  }
   0x3 LB: > { %s25_s17 = sadd.s32 1, %s1263_s15  ;;  %p67_p1 = scmp.ne.s32.totalorder %s1255_s13, %s1251_s12  ;;  %s1267_s16 = sphi %s1298_s16, %s13_s16   ;;  %s1263_s15 = sphi %s1296_s15, %s1573_s15   ;;  %s1259_s14 = sphi %s1294_s14, %s1572_s14   ;;  %s1255_s13 = sphi %s1292_s13, %s1571_s13   ;;  %s1251_s12 = sphi %s1290_s12, %s1570_s12  }
   0x4   : > { %p27_p0 = scmp.ge.s32.totalorder %s25_s17, 2  ;;  %p68_p2 = scmp.eq.s32.totalorder %s1267_s16, 0 }
   0x5   : > { %s60_s19 = sadd.s32 1, %s1255_s13  ;;  %p936_p5 = scmp.ge.s32.totalorder %s1267_s16, 2 }
   0x6   : > { %s1575_s17 = smov (%p27_p0, %s25_s17), 0  ;;  %p69_p3 = por %p68_p2, %p67_p1 }
   0x7   : > { %s56_s18 = ssub.s32 %s1263_s15, %s1575_s17  ;;  %152 = sbr.rel (%p936_p5) target bundleno = 64 (0x40), region = 24 }
   0x8   : > { %p58_p4 = scmp.eq.s32.totalorder %s56_s18, 0 }
   0xa   : > { %s1325_s20 = scalar_select %p58_p4, %s1255_s13, %s60_s19  }
   0xc   : > { %155 = sbr.rel (!%p69_p3) target bundleno = 64 (0x40), region = 28  ;;  %s157_s21 = sand.u32 (%p69_p3), 1, %s1255_s13  }
   0xd   : > { %s1136_s22 = sshll.u32 (%p69_p3), %s1263_s15, 3  ;;  %s1185_s23 = smul.u32 (%p69_p3), 384, %s157_s21 }
   0xe   : > { %s1333_s26 = scalar_lea.vmem (%p69_p3), %s1567_s1, %s1136_s22 }
   0xf   : > { %v288_v0 = vld [vmem:[%s1333_s26] sm:$0xff] (%p69_p3)  ;;  %v290_v1 = vld [vmem:[%s1333_s26 + $0x10] sm:$0xff] (%p69_p3)  ;;  %s1338_s27 = scalar_lea.vmem (%p69_p3), [#allocation3], %s1185_s23 }
  0x10   : > { %v292_v2 = vld [vmem:[%s1333_s26 + $0x20] sm:$0xff] (%p69_p3)  ;;  %289 = vst [vmem:[%s1338_s27] sm:$0xff] (%p69_p3), %v288_v0  ;;  %v294_v3 = vld [vmem:[%s1333_s26 + $0x30] sm:$0xff] (%p69_p3) }
  0x11   : > { %291 = vst [vmem:[%s1338_s27 + $0x8] sm:$0xff] %v290_v1  ;;  %v296_v4 = vld [vmem:[%s1333_s26 + $0x40] sm:$0xff]  ;;  %v298_v5 = vld [vmem:[%s1333_s26 + $0x50] sm:$0xff] }
  0x12   : > { %293 = vst [vmem:[%s1338_s27 + $0x10] sm:$0xff] %v292_v2  ;;  %v300_v6 = vld [vmem:[%s1333_s26 + $0x60] sm:$0xff]  ;;  %v302_v7 = vld [vmem:[%s1333_s26 + $0x70] sm:$0xff] }
  0x13   : > { %295 = vst [vmem:[%s1338_s27 + $0x18] sm:$0xff] %v294_v3  ;;  %v304_v8 = vld [vmem:[%s1333_s26 + $0x80] sm:$0xff]  ;;  %v306_v9 = vld [vmem:[%s1333_s26 + $0x90] sm:$0xff] }
  0x14   : > { %297 = vst [vmem:[%s1338_s27 + $0x20] sm:$0xff] %v296_v4  ;;  %v308_v10 = vld [vmem:[%s1333_s26 + $0xa0] sm:$0xff]  ;;  %v310_v11 = vld [vmem:[%s1333_s26 + $0xb0] sm:$0xff] }
  0x15   : > { %299 = vst [vmem:[%s1338_s27 + $0x28] sm:$0xff] %v298_v5  ;;  %v312_v12 = vld [vmem:[%s1333_s26 + $0xc0] sm:$0xff]  ;;  %v314_v13 = vld [vmem:[%s1333_s26 + $0xd0] sm:$0xff] }
  0x16   : > { %301 = vst [vmem:[%s1338_s27 + $0x30] sm:$0xff] %v300_v6  ;;  %v316_v14 = vld [vmem:[%s1333_s26 + $0xe0] sm:$0xff]  ;;  %v318_v15 = vld [vmem:[%s1333_s26 + $0xf0] sm:$0xff] }
  0x17   : > { %303 = vst [vmem:[%s1338_s27 + $0x38] sm:$0xff] %v302_v7  ;;  %v320_v16 = vld [vmem:[%s1333_s26 + $0x100] sm:$0xff]  ;;  %v322_v17 = vld [vmem:[%s1333_s26 + $0x110] sm:$0xff] }
  0x18   : > { %305 = vst [vmem:[%s1338_s27 + $0x40] sm:$0xff] %v304_v8  ;;  %v324_v18 = vld [vmem:[%s1333_s26 + $0x120] sm:$0xff]  ;;  %v326_v19 = vld [vmem:[%s1333_s26 + $0x130] sm:$0xff] }
  0x19   : > { %307 = vst [vmem:[%s1338_s27 + $0x48] sm:$0xff] %v306_v9  ;;  %v328_v20 = vld [vmem:[%s1333_s26 + $0x140] sm:$0xff]  ;;  %v330_v21 = vld [vmem:[%s1333_s26 + $0x150] sm:$0xff] }
  0x1a   : > { %309 = vst [vmem:[%s1338_s27 + $0x50] sm:$0xff] %v308_v10  ;;  %v332_v22 = vld [vmem:[%s1333_s26 + $0x160] sm:$0xff]  ;;  %v334_v23 = vld [vmem:[%s1333_s26 + $0x170] sm:$0xff] }
  0x1b   : > { %311 = vst [vmem:[%s1338_s27 + $0x58] sm:$0xff] %v310_v11  ;;  %v336_v24 = vld [vmem:[%s1333_s26 + $0x180] sm:$0xff]  ;;  %v338_v25 = vld [vmem:[%s1333_s26 + $0x190] sm:$0xff] }
  0x1c   : > { %313 = vst [vmem:[%s1338_s27 + $0x60] sm:$0xff] %v312_v12  ;;  %v340_v26 = vld [vmem:[%s1333_s26 + $0x1a0] sm:$0xff]  ;;  %v342_v27 = vld [vmem:[%s1333_s26 + $0x1b0] sm:$0xff] }
  0x1d   : > { %315 = vst [vmem:[%s1338_s27 + $0x68] sm:$0xff] %v314_v13  ;;  %v344_v28 = vld [vmem:[%s1333_s26 + $0x1c0] sm:$0xff]  ;;  %v346_v29 = vld [vmem:[%s1333_s26 + $0x1d0] sm:$0xff] }
  0x1e   : > { %317 = vst [vmem:[%s1338_s27 + $0x70] sm:$0xff] %v316_v14  ;;  %v348_v30 = vld [vmem:[%s1333_s26 + $0x1e0] sm:$0xff]  ;;  %v350_v31 = vld [vmem:[%s1333_s26 + $0x1f0] sm:$0xff] }
  0x1f   : > { %319 = vst [vmem:[%s1338_s27 + $0x78] sm:$0xff] %v318_v15  ;;  %v352_v32 = vld [vmem:[%s1333_s26 + $0x200] sm:$0xff]  ;;  %v354_v33 = vld [vmem:[%s1333_s26 + $0x210] sm:$0xff] }
  0x20   : > { %321 = vst [vmem:[%s1338_s27 + $0x80] sm:$0xff] %v320_v16  ;;  %v356_v34 = vld [vmem:[%s1333_s26 + $0x220] sm:$0xff]  ;;  %v358_v35 = vld [vmem:[%s1333_s26 + $0x230] sm:$0xff] }
  0x21   : > { %323 = vst [vmem:[%s1338_s27 + $0x88] sm:$0xff] %v322_v17  ;;  %v360_v36 = vld [vmem:[%s1333_s26 + $0x240] sm:$0xff]  ;;  %v362_v37 = vld [vmem:[%s1333_s26 + $0x250] sm:$0xff] }
  0x22   : > { %325 = vst [vmem:[%s1338_s27 + $0x90] sm:$0xff] %v324_v18  ;;  %v364_v38 = vld [vmem:[%s1333_s26 + $0x260] sm:$0xff]  ;;  %v366_v39 = vld [vmem:[%s1333_s26 + $0x270] sm:$0xff] }
  0x23   : > { %327 = vst [vmem:[%s1338_s27 + $0x98] sm:$0xff] %v326_v19  ;;  %v368_v40 = vld [vmem:[%s1333_s26 + $0x280] sm:$0xff]  ;;  %v370_v41 = vld [vmem:[%s1333_s26 + $0x290] sm:$0xff] }
  0x24   : > { %329 = vst [vmem:[%s1338_s27 + $0xa0] sm:$0xff] %v328_v20  ;;  %v372_v42 = vld [vmem:[%s1333_s26 + $0x2a0] sm:$0xff]  ;;  %v374_v43 = vld [vmem:[%s1333_s26 + $0x2b0] sm:$0xff] }
  0x25   : > { %331 = vst [vmem:[%s1338_s27 + $0xa8] sm:$0xff] %v330_v21  ;;  %v376_v44 = vld [vmem:[%s1333_s26 + $0x2c0] sm:$0xff]  ;;  %v378_v45 = vld [vmem:[%s1333_s26 + $0x2d0] sm:$0xff] }
  0x26   : > { %333 = vst [vmem:[%s1338_s27 + $0xb0] sm:$0xff] %v332_v22  ;;  %v380_v46 = vld [vmem:[%s1333_s26 + $0x2e0] sm:$0xff]  ;;  %v382_v47 = vld [vmem:[%s1333_s26 + $0x2f0] sm:$0xff] }
  0x27   : > { %335 = vst [vmem:[%s1338_s27 + $0xb8] sm:$0xff] %v334_v23 }
  0x28   : > { %337 = vst [vmem:[%s1338_s27 + $0xc0] sm:$0xff] %v336_v24 }
  0x29   : > { %339 = vst [vmem:[%s1338_s27 + $0xc8] sm:$0xff] %v338_v25 }
  0x2a   : > { %341 = vst [vmem:[%s1338_s27 + $0xd0] sm:$0xff] %v340_v26 }
  0x2b   : > { %343 = vst [vmem:[%s1338_s27 + $0xd8] sm:$0xff] %v342_v27 }
  0x2c   : > { %345 = vst [vmem:[%s1338_s27 + $0xe0] sm:$0xff] %v344_v28 }
  0x2d   : > { %347 = vst [vmem:[%s1338_s27 + $0xe8] sm:$0xff] %v346_v29 }
  0x2e   : > { %349 = vst [vmem:[%s1338_s27 + $0xf0] sm:$0xff] %v348_v30 }
  0x2f   : > { %351 = vst [vmem:[%s1338_s27 + $0xf8] sm:$0xff] %v350_v31 }
  0x30   : > { %353 = vst [vmem:[%s1338_s27 + $0x100] sm:$0xff] %v352_v32 }
  0x31   : > { %355 = vst [vmem:[%s1338_s27 + $0x108] sm:$0xff] %v354_v33 }
  0x32   : > { %357 = vst [vmem:[%s1338_s27 + $0x110] sm:$0xff] %v356_v34 }
  0x33   : > { %359 = vst [vmem:[%s1338_s27 + $0x118] sm:$0xff] %v358_v35 }
  0x34   : > { %361 = vst [vmem:[%s1338_s27 + $0x120] sm:$0xff] %v360_v36 }
  0x35   : > { %363 = vst [vmem:[%s1338_s27 + $0x128] sm:$0xff] %v362_v37 }
  0x36   : > { %365 = vst [vmem:[%s1338_s27 + $0x130] sm:$0xff] %v364_v38 }
  0x37   : > { %367 = vst [vmem:[%s1338_s27 + $0x138] sm:$0xff] %v366_v39 }
  0x38   : > { %369 = vst [vmem:[%s1338_s27 + $0x140] sm:$0xff] %v368_v40 }
  0x39   : > { %371 = vst [vmem:[%s1338_s27 + $0x148] sm:$0xff] %v370_v41 }
  0x3a   : > { %373 = vst [vmem:[%s1338_s27 + $0x150] sm:$0xff] %v372_v42 }
  0x3b   : > { %375 = vst [vmem:[%s1338_s27 + $0x158] sm:$0xff] %v374_v43 }
  0x3c   : > { %377 = vst [vmem:[%s1338_s27 + $0x160] sm:$0xff] %v376_v44 }
  0x3d   : > { %379 = vst [vmem:[%s1338_s27 + $0x168] sm:$0xff] %v378_v45 }
  0x3e   : > { %381 = vst [vmem:[%s1338_s27 + $0x170] sm:$0xff] %v380_v46 }
  0x3f   : > { %383 = vst [vmem:[%s1338_s27 + $0x178] sm:$0xff] %v382_v47 }
  0x40 PF: > { %p939_p6 = scmp.ge.s32.totalorder %s1267_s16, 1  ;;  %p388_p7 = scmp.lt.s32.totalorder %s1267_s16, 3 }
  0x42   : > { %p389_p8 = pnand %p939_p6, %p388_p7 }
  0x43   : > { %s395_s28 = sand.u32 (!%p389_p8), 1, %s1251_s12   ;;  %s940_s10 = sshll.u32 (!%p389_p8), %s1259_s14, 1 }
  0x44   : > { %392 = sbr.rel (%p389_p8) target bundleno = 274 (0x112), region = 66  ;;  %p432_p9 = scmp.lt.s32.totalorder (!%p389_p8), %s940_s10, 3 }
  0x45   : > { %s1186_s29 = smul.u32 (!%p389_p8), 384, %s395_s28 }
  0x47   : > { %s1436_s30 = scalar_lea.vmem (!%p389_p8), [#allocation3], %s1186_s29 }
  0x49   : > { %v1000_v48 = vld [vmem:[%s1436_s30 + $0x70] sm:$0xf]  ;;  %v1152_v49 = vld [vmem:[%s1436_s30 + $0x74] sm:$0xf0]  ;;  %v992_v53 = vld [vmem:[%s1436_s30 + $0x60] sm:$0xf] }
  0x4a   : > { %v1064_v50 = vld [vmem:[%s1436_s30 + $0xf0] sm:$0xf]  ;;  %v1001_v51 = vor.u32 %v1152_v49, %v1000_v48  ;;  %v1168_v52 = vld [vmem:[%s1436_s30 + $0xf4] sm:$0xf0]  ;;  %v1150_v54 = vld [vmem:[%s1436_s30 + $0x64] sm:$0xf0] }
  0x4b   : > { %v1065_v55 = vor.u32 %v1168_v52, %v1064_v50  ;;  %v1056_v56 = vld [vmem:[%s1436_s30 + $0xe0] sm:$0xf]  ;;  %v1166_v57 = vld [vmem:[%s1436_s30 + $0xe4] sm:$0xf0]  ;;  %v993_v58 = vor.u32 %v1150_v54, %v992_v53  ;;  %v984_v59 = vld [vmem:[%s1436_s30 + $0x50] sm:$0xf] }
  0x4c   : > { %746 = vmatpush.bf16.msra.mxu0 %v1001_v51  ;;  %v1057_v60 = vor.u32 %v1166_v57, %v1056_v56  ;;  %v1148_v61 = vld [vmem:[%s1436_s30 + $0x54] sm:$0xf0]  ;;  %v1128_v62 = vld [vmem:[%s1436_s30 + $0x170] sm:$0xf]  ;;  %v1120_v3 = vld [vmem:[%s1436_s30 + $0x160] sm:$0xf] }
  0x4d   : > { %759 = vmatpush.bf16.msra.mxu1 %v1065_v55  ;;  %v1184_v63 = vld [vmem:[%s1436_s30 + $0x174] sm:$0xf0]  ;;  %v1048_v0 = vld [vmem:[%s1436_s30 + $0xd0] sm:$0xf]  ;;  %v1182_v4 = vld [vmem:[%s1436_s30 + $0x164] sm:$0xf0]  ;;  %v985_v6 = vor.u32 %v1148_v61, %v984_v59 }
  0x4e   : > { %v1164_v1 = vld [vmem:[%s1436_s30 + $0xd4] sm:$0xf0]  ;;  %v1129_v2 = vor.u32 %v1184_v63, %v1128_v62  ;;  %v1151_v5 = vld [vmem:[%s1436_s30 + $0x74] sm:$0xf]  ;;  %v976_v7 = vld [vmem:[%s1436_s30 + $0x40] sm:$0xf]  ;;  %v1121_v9 = vor.u32 %v1182_v4, %v1120_v3 }
  0x4f   : > { %v1146_v8 = vld [vmem:[%s1436_s30 + $0x44] sm:$0xf0]  ;;  %v1002_v10 = vld [vmem:[%s1436_s30 + $0x78] sm:$0xf0]  ;;  %v1049_v11 = vor.u32 %v1164_v1, %v1048_v0  ;;  %v1040_v12 = vld [vmem:[%s1436_s30 + $0xc0] sm:$0xf] }
  0x50   : > { %747 = vmatpush.bf16.msra.mxu0 %v993_v58  ;;  %772 = vmatpush.bf16.msra.mxu2 %v1129_v2  ;;  %v1162_v13 = vld [vmem:[%s1436_s30 + $0xc4] sm:$0xf0]  ;;  %v1005_v14 = vor.u32 %v1151_v5, %v1002_v10  ;;  %v1112_v15 = vld [vmem:[%s1436_s30 + $0x150] sm:$0xf]  ;;  %v1180_v16 = vld [vmem:[%s1436_s30 + $0x154] sm:$0xf0]  ;;  %v977_v20 = vor.u32 %v1146_v8, %v976_v7 }
  0x51   : > { %760 = vmatpush.bf16.msra.mxu1 %v1057_v60  ;;  %v1149_v17 = vld [vmem:[%s1436_s30 + $0x64] sm:$0xf]  ;;  %v994_v18 = vld [vmem:[%s1436_s30 + $0x68] sm:$0xf0]  ;;  %v968_v21 = vld [vmem:[%s1436_s30 + $0x30] sm:$0xf]  ;;  %v1113_v23 = vor.u32 %v1180_v16, %v1112_v15  ;;  %v1041_v25 = vor.u32 %v1162_v13, %v1040_v12 }
  0x52   : > { %785 = vmatpush.bf16.msra.mxu3 %v1005_v14  ;;  %v997_v19 = vor.u32 %v1149_v17, %v994_v18  ;;  %v1144_v22 = vld [vmem:[%s1436_s30 + $0x34] sm:$0xf0]  ;;  %v1104_v24 = vld [vmem:[%s1436_s30 + $0x140] sm:$0xf]  ;;  %v1178_v26 = vld [vmem:[%s1436_s30 + $0x144] sm:$0xf0] }
  0x53   : > { %v1147_v27 = vld [vmem:[%s1436_s30 + $0x54] sm:$0xf]  ;;  %v986_v28 = vld [vmem:[%s1436_s30 + $0x58] sm:$0xf0]  ;;  %v1032_v29 = vld [vmem:[%s1436_s30 + $0xb0] sm:$0xf]  ;;  %v969_v32 = vor.u32 %v1144_v22, %v968_v21  ;;  %v1105_v34 = vor.u32 %v1178_v26, %v1104_v24 }
  0x54   : > { %748 = vmatpush.bf16.msra.mxu0 %v985_v6  ;;  %773 = vmatpush.bf16.msra.mxu2 %v1121_v9  ;;  %v1160_v30 = vld [vmem:[%s1436_s30 + $0xb4] sm:$0xf0]  ;;  %v989_v31 = vor.u32 %v1147_v27, %v986_v28  ;;  %v960_v33 = vld [vmem:[%s1436_s30 + $0x20] sm:$0xf]  ;;  %v1145_v35 = vld [vmem:[%s1436_s30 + $0x44] sm:$0xf] }
  0x55   : > { %761 = vmatpush.bf16.msra.mxu1 %v1049_v11  ;;  %v978_v36 = vld [vmem:[%s1436_s30 + $0x48] sm:$0xf0]  ;;  %v1033_v37 = vor.u32 %v1160_v30, %v1032_v29  ;;  %v1142_v38 = vld [vmem:[%s1436_s30 + $0x24] sm:$0xf0]  ;;  %v1096_v39 = vld [vmem:[%s1436_s30 + $0x130] sm:$0xf] }
  0x56   : > { %786 = vmatpush.bf16.msra.mxu3 %v997_v19  ;;  %v1176_v40 = vld [vmem:[%s1436_s30 + $0x134] sm:$0xf0]  ;;  %v1024_v41 = vld [vmem:[%s1436_s30 + $0xa0] sm:$0xf]  ;;  %v1158_v42 = vld [vmem:[%s1436_s30 + $0xa4] sm:$0xf0]  ;;  %v981_v43 = vor.u32 %v1145_v35, %v978_v36  ;;  %v961_v44 = vor.u32 %v1142_v38, %v960_v33 }
  0x57   : > { %v952_v45 = vld [vmem:[%s1436_s30 + $0x10] sm:$0xf]  ;;  %v1097_v46 = vor.u32 %v1176_v40, %v1096_v39  ;;  %v1143_v47 = vld [vmem:[%s1436_s30 + $0x34] sm:$0xf]  ;;  %v970_v48 = vld [vmem:[%s1436_s30 + $0x38] sm:$0xf0]  ;;  %v1025_v49 = vor.u32 %v1158_v42, %v1024_v41 }
  0x58   : > { %749 = vmatpush.bf16.msra.mxu0 %v977_v20  ;;  %774 = vmatpush.bf16.msra.mxu2 %v1113_v23  ;;  %v1140_v50 = vld [vmem:[%s1436_s30 + $0x14] sm:$0xf0]  ;;  %v1088_v51 = vld [vmem:[%s1436_s30 + $0x120] sm:$0xf]  ;;  %v1174_v52 = vld [vmem:[%s1436_s30 + $0x124] sm:$0xf0]  ;;  %v973_v57 = vor.u32 %v1143_v47, %v970_v48 }
  0x59   : > { %762 = vmatpush.bf16.msra.mxu1 %v1041_v25  ;;  %v1016_v53 = vld [vmem:[%s1436_s30 + $0x90] sm:$0xf]  ;;  %v1156_v54 = vld [vmem:[%s1436_s30 + $0x94] sm:$0xf0]  ;;  %v944_v55 = vld [vmem:[%s1436_s30] sm:$0xf]  ;;  %v953_v58 = vor.u32 %v1140_v50, %v952_v45  ;;  %v1089_v59 = vor.u32 %v1174_v52, %v1088_v51 }
  0x5a   : > { %787 = vmatpush.bf16.msra.mxu3 %v989_v31  ;;  %v1138_v56 = vld [vmem:[%s1436_s30 + $0x4] sm:$0xf0]  ;;  %v1141_v60 = vld [vmem:[%s1436_s30 + $0x24] sm:$0xf]  ;;  %v962_v61 = vld [vmem:[%s1436_s30 + $0x28] sm:$0xf0]  ;;  %v1017_v63 = vor.u32 %v1156_v54, %v1016_v53 }
  0x5b   : > { %v445_v62 = vld [vmem:[%s1566_s0] sm:$0xff]  ;;  %v1008_v0 = vld [vmem:[%s1436_s30 + $0x80] sm:$0xf]  ;;  %v1080_v1 = vld [vmem:[%s1436_s30 + $0x110] sm:$0xf]  ;;  %v965_v8 = vor.u32 %v1141_v60, %v962_v61  ;;  %v945_v10 = vor.u32 %v1138_v56, %v944_v55  ;;  %v1269_v36 = vmov 0  }
  0x5c   : > { %750 = vmatpush.bf16.msra.mxu0 %v969_v32  ;;  %775 = vmatpush.bf16.msra.mxu2 %v1105_v34  ;;  %v1172_v2 = vld [vmem:[%s1436_s30 + $0x114] sm:$0xf0]  ;;  %v1154_v3 = vld [vmem:[%s1436_s30 + $0x84] sm:$0xf0]  ;;  %v1167_v4 = vld [vmem:[%s1436_s30 + $0xf4] sm:$0xf]  ;;  %v497_v9 = vunpack.c.l.b16 %v445_v62  ;;  %v498_v12 = vunpack.c.h.b16 %v445_v62 }
  0x5d   : > { %763 = vmatpush.bf16.msra.mxu1 %v1033_v37  ;;  %v1066_v5 = vld [vmem:[%s1436_s30 + $0xf8] sm:$0xf0]  ;;  %v1183_v6 = vld [vmem:[%s1436_s30 + $0x174] sm:$0xf]  ;;  %v1081_v11 = vor.u32 %v1172_v2, %v1080_v1  ;;  %v446_v15 = vld [vmem:[%s1566_s0 + $0x8] sm:$0xf]  ;;  %v1009_v16 = vor.u32 %v1154_v3, %v1008_v0  ;;  %1228 = vset.pattern.permute.xlu0 %v1269_v36 }
  0x5e   : > { %788 = vmatpush.bf16.msra.mxu3 %v981_v43  ;;  %v1130_v7 = vld [vmem:[%s1436_s30 + $0x178] sm:$0xf0]  ;;  %v1139_v13 = vld [vmem:[%s1436_s30 + $0x14] sm:$0xf]  ;;  %v1069_v17 = vor.u32 %v1167_v4, %v1066_v5  ;;  %v1072_v18 = vld [vmem:[%s1436_s30 + $0x100] sm:$0xf]  ;;  %v500_v25 = vpack.c.b16 %v497_v9, %v497_v9  ;;  %v499_v27 = vunpack.c.l.b16 %v446_v15  ;;  %v1514_v28 = vpack.c.b16 %v498_v12, %v498_v12 }
  0x5f   : > { %v954_v14 = vld [vmem:[%s1436_s30 + $0x18] sm:$0xf0]  ;;  %v1170_v19 = vld [vmem:[%s1436_s30 + $0x104] sm:$0xf0]  ;;  %v1133_v20 = vor.u32 %v1183_v6, %v1130_v7  ;;  %v1165_v21 = vld [vmem:[%s1436_s30 + $0xe4] sm:$0xf] }
  0x60   : > { %751 = vmatpush.bf16.msra.mxu0 %v961_v44  ;;  %776 = vmatpush.bf16.msra.mxu2 %v1097_v46  ;;  %v1058_v22 = vld [vmem:[%s1436_s30 + $0xe8] sm:$0xf0]  ;;  %v1181_v23 = vld [vmem:[%s1436_s30 + $0x164] sm:$0xf]  ;;  %v957_v26 = vor.u32 %v1139_v13, %v954_v14  ;;  %v1073_v29 = vor.u32 %v1170_v19, %v1072_v18  ;;  %v1163_v34 = vld [vmem:[%s1436_s30 + $0xd4] sm:$0xf]  ;;  %v502_v40 = vpack.c.b16 %v499_v27, %v499_v27 }
  0x61   : > { %764 = vmatpush.bf16.msra.mxu1 %v1025_v49  ;;  %v1122_v24 = vld [vmem:[%s1436_s30 + $0x168] sm:$0xf0]  ;;  %v1137_v30 = vld [vmem:[%s1436_s30 + $0x4] sm:$0xf]  ;;  %v1061_v32 = vor.u32 %v1165_v21, %v1058_v22  ;;  %v1050_v35 = vld [vmem:[%s1436_s30 + $0xd8] sm:$0xf0] }
  0x62   : > { %789 = vmatpush.bf16.msra.mxu3 %v973_v57  ;;  %v946_v31 = vld [vmem:[%s1436_s30 + $0x8] sm:$0xf0]  ;;  %v1125_v33 = vor.u32 %v1181_v23, %v1122_v24  ;;  %v1179_v38 = vld [vmem:[%s1436_s30 + $0x154] sm:$0xf]  ;;  %v1114_v39 = vld [vmem:[%s1436_s30 + $0x158] sm:$0xf0]  ;;  %v1053_v42 = vor.u32 %v1163_v34, %v1050_v35 }
  0x63   : > { %v833_v37 = vld [vmem:[%s1568_s2] sm:$0xff]  ;;  %v949_v41 = vor.u32 %v1137_v30, %v946_v31  ;;  %v1117_v43 = vor.u32 %v1179_v38, %v1114_v39  ;;  %v1161_v44 = vld [vmem:[%s1436_s30 + $0xc4] sm:$0xf]  ;;  %v1159_v50 = vld [vmem:[%s1436_s30 + $0xb4] sm:$0xf]  ;;  %s1577_s10 = smov (!%p432_p9, %s940_s10), 3 }
  0x64   : > { %752 = vmatpush.bf16.msra.mxu0 %v953_v58  ;;  %777 = vmatpush.bf16.msra.mxu2 %v1089_v59  ;;  %v1042_v45 = vld [vmem:[%s1436_s30 + $0xc8] sm:$0xf0]  ;;  %v1177_v46 = vld [vmem:[%s1436_s30 + $0x144] sm:$0xf]  ;;  %v1034_v51 = vld [vmem:[%s1436_s30 + $0xb8] sm:$0xf0] }
  0x65   : > { %765 = vmatpush.bf16.msra.mxu1 %v1017_v63  ;;  %836 = vperm.xlu0 %1228, %v833_v37   ;;  %v1106_v47 = vld [vmem:[%s1436_s30 + $0x148] sm:$0xf0]  ;;  %v1045_v48 = vor.u32 %v1161_v44, %v1042_v45  ;;  %v1175_v52 = vld [vmem:[%s1436_s30 + $0x134] sm:$0xf]  ;;  %v1098_v53 = vld [vmem:[%s1436_s30 + $0x138] sm:$0xf0]  ;;  %v1037_v54 = vor.u32 %v1159_v50, %v1034_v51 }
  0x66   : > { %790 = vmatpush.bf16.msra.mxu3 %v965_v8  ;;  %v1109_v49 = vor.u32 %v1177_v46, %v1106_v47  ;;  %v1101_v55 = vor.u32 %v1175_v52, %v1098_v53  ;;  %v1157_v56 = vld [vmem:[%s1436_s30 + $0xa4] sm:$0xf]  ;;  %v1026_v57 = vld [vmem:[%s1436_s30 + $0xa8] sm:$0xf0]  ;;  %v1155_v62 = vld [vmem:[%s1436_s30 + $0x94] sm:$0xf] }
  0x67   : > { %v1173_v58 = vld [vmem:[%s1436_s30 + $0x124] sm:$0xf]  ;;  %v1090_v59 = vld [vmem:[%s1436_s30 + $0x128] sm:$0xf0]  ;;  %v1029_v60 = vor.u32 %v1157_v56, %v1026_v57  ;;  %v1018_v63 = vld [vmem:[%s1436_s30 + $0x98] sm:$0xf0] }
  0x68   : > { %753 = vmatpush.bf16.msra.mxu0 %v945_v10  ;;  %778 = vmatpush.bf16.msra.mxu2 %v1081_v11  ;;  %v1093_v61 = vor.u32 %v1173_v58, %v1090_v59  ;;  %v1171_v0 = vld [vmem:[%s1436_s30 + $0x114] sm:$0xf]  ;;  %v1082_v1 = vld [vmem:[%s1436_s30 + $0x118] sm:$0xf0]  ;;  %v1021_v2 = vor.u32 %v1155_v62, %v1018_v63  ;;  %v1153_v4 = vld [vmem:[%s1436_s30 + $0x84] sm:$0xf] }
  0x69   : > { %766 = vmatpush.bf16.msra.mxu1 %v1009_v16  ;;  %v1085_v3 = vor.u32 %v1171_v0, %v1082_v1  ;;  %v1010_v5 = vld [vmem:[%s1436_s30 + $0x88] sm:$0xf0]  ;;  %v1169_v6 = vld [vmem:[%s1436_s30 + $0x104] sm:$0xf]  ;;  %s941_s11 = sshll.u32 %s1577_s10, 3 }
  0x6a   : > { %791 = vmatpush.bf16.msra.mxu3 %v957_v26  ;;  %v1074_v7 = vld [vmem:[%s1436_s30 + $0x108] sm:$0xf0]  ;;  %v1013_v8 = vor.u32 %v1153_v4, %v1010_v5  ;;  %s435_s19 = scalar_lea.vmem %s1569_s3, %s941_s11 }
  0x6b   : > { %754 = vmatmul.bf16.vlgmr.msra.gmra.mxu0 %v500_v25  ;;  %v1077_v9 = vor.u32 %v1169_v6, %v1074_v7 }
  0x6c   : > { %798 = vmatpush.bf16.msrb.mxu0 %v1069_v17  ;;  %767 = vmatmul.bf16.vlgmr.msra.gmra.mxu1 %v1514_v28 }
  0x6d   : > { %811 = vmatpush.bf16.msrb.mxu1 %v1133_v20  ;;  %779 = vmatpush.bf16.msra.mxu2 %v1073_v29 }
  0x6e   : > { %792 = vmatpush.bf16.msra.mxu3 %v949_v41 }
  0x70   : > { %799 = vmatpush.bf16.msrb.mxu0 %v1061_v32  ;;  %780 = vmatmul.bf16.vlgmr.msra.gmra.mxu2 %v502_v40 }
  0x71   : > { %812 = vmatpush.bf16.msrb.mxu1 %v1125_v33  ;;  %793 = vmatmul.bf16.vlgmr.msra.gmra.mxu3 %v500_v25 }
  0x74   : > { %800 = vmatpush.bf16.msrb.mxu0 %v1053_v42 }
  0x75   : > { %813 = vmatpush.bf16.msrb.mxu1 %v1117_v43 }
  0x78   : > { %801 = vmatpush.bf16.msrb.mxu0 %v1045_v48 }
  0x79   : > { %814 = vmatpush.bf16.msrb.mxu1 %v1109_v49 }
  0x7c   : > { %802 = vmatpush.bf16.msrb.mxu0 %v1037_v54 }
  0x7d   : > { %815 = vmatpush.bf16.msrb.mxu1 %v1101_v55 }
  0x80   : > { %803 = vmatpush.bf16.msrb.mxu0 %v1029_v60 }
  0x81   : > { %816 = vmatpush.bf16.msrb.mxu1 %v1093_v61 }
  0x84   : > { %804 = vmatpush.bf16.msrb.mxu0 %v1021_v2 }
  0x85   : > { %817 = vmatpush.bf16.msrb.mxu1 %v1085_v3 }
  0x88   : > { %805 = vmatpush.bf16.msrb.mxu0 %v1013_v8 }
  0x89   : > { %818 = vmatpush.bf16.msrb.mxu1 %v1077_v9 }
  0x8b   : > { %806 = vmatmul.bf16.vlgmr.msrb.gmra.mxu0 %v1514_v28 }
  0x8c   : > { %819 = vmatmul.bf16.vlgmr.msrb.gmra.mxu1 %v502_v40 }
  0xd7   : > { %v837_v16 = vpop.permute.xlu0 %836 }
  0xe8   : > { %v755_v10 = vpop.f32.mrf.mxu0 }
  0xe9   : > { %v768_v11 = vpop.f32.mrf.mxu1 }
  0xea   : > { %v769_v12 = vadd.f32 %v768_v11, %v755_v10 }
  0xf0   : > { %v757_v13 = vpop.f32.mrf.mxu0 }
  0xf1   : > { %v770_v14 = vpop.f32.mrf.mxu1 }
  0xf3   : > { %v781_v15 = vpop.f32.mrf.mxu2 }
  0xf4   : > { %v782_v17 = vadd.f32 %v781_v15, %v769_v12  ;;  %v794_v19 = vpop.f32.mrf.mxu3 }
  0xf6   : > { %v839_v18 = vadd.f32 %v837_v16, %v782_v17 }
  0xf8   : > { %841 = vst [vmem:[%s435_s19] sm:$0xff] %v839_v18 }
  0xfb   : > { %v783_v20 = vpop.f32.mrf.mxu2 }
  0xfc   : > { %v796_v21 = vpop.f32.mrf.mxu3 }
 0x108   : > { %v807_v22 = vpop.f32.mrf.mxu0 }
 0x109   : > { %v808_v23 = vadd.f32 %v807_v22, %v794_v19  ;;  %v820_v24 = vpop.f32.mrf.mxu1 }
 0x10b   : > { %v821_v25 = vadd.f32 %v820_v24, %v808_v23 }
 0x10d   : > { %v840_v26 = vadd.f32 %v837_v16, %v821_v25 }
 0x10f   : > { %842 = vst [vmem:[%s435_s19 + $0x8] sm:$0xff] %v840_v26 }
 0x110   : > { %v809_v27 = vpop.f32.mrf.mxu0 }
 0x111   : > { %v822_v28 = vpop.f32.mrf.mxu1 }
 0x112 PF: > { %s13_s16 = sadd.s32 1, %s1267_s16   ;;  %s1570_s12 = smov %s1255_s13 }
 0x113   : > { %p10_p10 = scmp.ge.s32.totalorder %s13_s16, 4   ;;  %s1571_s13 = smov %s1325_s20 }
 0x114   : > { %s1572_s14 = smov %s1263_s15  ;;  %s1573_s15 = smov %s1575_s17 }
 0x115   :  { %12 = sbr.rel (!%p10_p10) target bundleno = 3 (0x3), region = 116 }

</bundles_post_ra>
